<compile_context>
chip_gen: v6e
topology: v6e:2x2x1
jax: 0.10.0
libtpu: 0.0.40
codegen_flags: <defaults>
</compile_context>

<pallas_src>
import functools

import jax
import jax.numpy as jnp
from jax.experimental import pallas as pl
from jax.experimental.pallas import tpu as pltpu


def _round_up(v: int, m: int) -> int:
    return ((v + m - 1) // m) * m


def _rbf_sep_kernel(scale_ref, w1_ref, x_ref, p_ref, o_ref, *, ncx_p, ncv_p, ncv):
    # scale_ref, w1_ref : SMEM (1,) scalars: -1/(2*sigma^2) and the bias w1.
    # x_ref : (2, TN) VMEM; row 0 = pos, row 1 = vel (N on lanes -> lane-dense).
    # p_ref : (R, 1)  VMEM parameter slab, resident for the whole call:
    #           rows [0, ncx_p)                    : centers_x   (zero padded)
    #           rows [ncx_p, ncx_p+ncv_p)          : centers_x_dot (zero padded)
    #           rows [base + j*ncx_p, +ncx_p) j<ncv: column j of SW = (signs*weights).reshape(ncx,ncv)
    #         Padded rows of each SW column are zero, so padded pos-centers are inert;
    #         padded vel-centers are never read (loop runs over the true ncv only).
    # o_ref : (1, TN) VMEM f32 lane-dense output row; written once per N tile.
    s = scale_ref[0]
    x0 = x_ref[0:1, :]                               # (1, TN)
    x1 = x_ref[1:2, :]                               # (1, TN)

    cx = p_ref[0:ncx_p, :]                           # (ncx_p, 1)
    cv = p_ref[ncx_p:ncx_p + ncv_p, :]               # (ncv_p, 1)

    dx = x0 - cx                                     # (ncx_p, TN)
    ex = jnp.exp(dx * dx * s)                        # EUP exp, N*(ncx) transcendentals
    dv = x1 - cv                                     # (ncv_p, TN)
    ev = jnp.exp(dv * dv * s)                        # EUP exp, N*(ncv) transcendentals

    # inner[i, n] = sum_j SW[i, j] * Ev[j, n]  -- kept on the VPU in exact f32
    # (tiny contraction; MXU f32 path would lose precision through bf16 passes).
    base = ncx_p + ncv_p
    acc = jnp.zeros_like(ex)                         # (ncx_p, TN)
    for j in range(ncv):                             # static unroll (ncv is small)
        sw_j = p_ref[base + j * ncx_p: base + (j + 1) * ncx_p, :]   # (ncx_p, 1)
        acc = acc + sw_j * ev[j:j + 1, :]

    # out[n] = sum_i Ex[i, n] * inner[i, n] + w1  (sublane reduce on the XLU).
    o_ref[...] = jnp.sum(ex * acc, axis=0, keepdims=True) + w1_ref[0]


def pack_rbf_params(sigma, w1, centers_x, centers_x_dot, signs, weights):
    """One-time packing of RBFnet_closedv2 parameters for the Pallas kernel.

    Exploits the meshgrid structure of all_centers: stores centers_x, centers_x_dot
    and the columns of SW = (signs*weights).reshape(ncx, ncv) in a single (R, 1)
    f32 slab (one DMA descriptor; a few KB, resident for the whole call).
    """
    centers_x = jnp.asarray(centers_x, jnp.float32)
    centers_x_dot = jnp.asarray(centers_x_dot, jnp.float32)
    signs = jnp.asarray(signs, jnp.float32)
    weights = jnp.asarray(weights, jnp.float32)
    sigma = jnp.asarray(sigma, jnp.float32)

    ncx = int(centers_x.shape[0])
    ncv = int(centers_x_dot.shape[0])
    # meshgrid 'ij': all_centers row index = i*ncv + j  ->  SW[i, j]
    sw = (signs * weights).reshape(ncx, ncv)

    ncx_p = _round_up(max(ncx, 8), 8)
    ncv_p = _round_up(max(ncv, 8), 8)

    cx_col = jnp.zeros((ncx_p, 1), jnp.float32).at[:ncx, 0].set(centers_x)
    cv_col = jnp.zeros((ncv_p, 1), jnp.float32).at[:ncv, 0].set(centers_x_dot)
    # row j of sw_cols = column j of SW, zero-padded to ncx_p (padded pos-centers inert)
    sw_cols = jnp.zeros((ncv, ncx_p), jnp.float32).at[:, :ncx].set(sw.T)
    slab = jnp.concatenate([cx_col, cv_col, sw_cols.reshape(ncv * ncx_p, 1)], axis=0)

    scale = jnp.asarray(-1.0 / (2.0 * sigma * sigma), jnp.float32).reshape(1)
    w1a = jnp.asarray(w1, jnp.float32).reshape(1)
    return {"slab": slab, "scale": scale, "w1": w1a,
            "ncx_p": ncx_p, "ncv_p": ncv_p, "ncv": ncv}


def rbf_forward(x, params, *, tile_n_max=2048):
    """Pallas forward: x (N, 2) float32 -> (N,) float32."""
    x = jnp.asarray(x, jnp.float32)
    if x.ndim == 1:
        x = x.reshape(1, 2)
    N = x.shape[0]

    slab, scale, w1a = params["slab"], params["scale"], params["w1"]
    ncx_p, ncv_p, ncv = params["ncx_p"], params["ncv_p"], params["ncv"]
    R = slab.shape[0]

    # N lives on lanes: pad to a multiple of 128.  Use >= 2 (even) tiles whenever
    # Np >= 256 so the "parallel" axis can be split across v7x's two TensorCores,
    # otherwise one big tile (per-step overhead amortization).
    Np = _round_up(N, 128)
    if Np < 256:
        n_tiles = 1
    else:
        n_tiles = max(2, -(-Np // tile_n_max))
        if n_tiles % 2:
            n_tiles += 1
    tile_n = _round_up(-(-Np // n_tiles), 128)
    Np = tile_n * n_tiles

    # Per-call x prep only: (N, 2) -> lane-dense (2, Np).
    xt = jnp.zeros((2, Np), jnp.float32).at[:, :N].set(x.T)

    kernel = functools.partial(_rbf_sep_kernel, ncx_p=ncx_p, ncv_p=ncv_p, ncv=ncv)

    out = pl.pallas_call(
        kernel,
        out_shape=jax.ShapeDtypeStruct((1, Np), jnp.float32),
        grid_spec=pltpu.PrefetchScalarGridSpec(
            num_scalar_prefetch=0,
            grid=(n_tiles,),
            in_specs=[
                pl.BlockSpec(memory_space=pltpu.MemorySpace.SMEM),   # scale
                pl.BlockSpec(memory_space=pltpu.MemorySpace.SMEM),   # w1
                pl.BlockSpec((2, tile_n), lambda i: (0, i)),         # x (2, Np)
                pl.BlockSpec((R, 1), lambda i: (0, 0)),              # parameter slab (resident)
            ],
            out_specs=pl.BlockSpec((1, tile_n), lambda i: (0, i)),
        ),
        compiler_params=pltpu.CompilerParams(
            dimension_semantics=("parallel",),
        ),
        cost_estimate=pl.CostEstimate(
            flops=Np * (3 * (ncx_p + ncv_p) + 2 * ncv * ncx_p + 2 * ncx_p + 1),
            transcendentals=Np * (ncx_p + ncv_p),
            bytes_accessed=4 * (3 * Np + R),
        ),
    )(scale, w1a, xt, slab)

    return out[0, :N]


def build_params(num_centers=8, final_pos=1.0, sigma=1.0, key=None):
    """Deterministic parameter construction mirroring RBFnet_closedv2.__init__."""
    net_range = 1.5 * final_pos
    centers_x = jnp.linspace(-final_pos, net_range - final_pos, num_centers)
    centers_x_dot = jnp.linspace(-5.0, 5.0, num_centers)
    # torch.meshgrid default indexing is 'ij'
    c1, c2 = jnp.meshgrid(centers_x, centers_x_dot, indexing="ij")
    all_centers = jnp.stack([c1.ravel(), c2.ravel()], axis=1)     # (C, 2)
    C = all_centers.shape[0]

    if key is None:
        key = jax.random.PRNGKey(0)
    weights = jax.random.uniform(key, (C,), dtype=jnp.float32)    # torch.rand

    signs = jnp.array([(-1.0) ** (i + 1) for i in range(C)], dtype=jnp.float32)
    signs = signs.at[0].set(0.0)

    return {
        "sigma": jnp.asarray(sigma, jnp.float32),
        "w1": jnp.asarray(0.0, jnp.float32),
        "centers_x": centers_x.astype(jnp.float32),
        "centers_x_dot": centers_x_dot.astype(jnp.float32),
        "all_centers": all_centers.astype(jnp.float32),
        "signs": signs,
        "weights": weights,
    }


def rbf_forward_ref(x, sigma, w1, all_centers, signs, weights):
    """Pure-JAX reference matching the PyTorch forward exactly (full f32)."""
    if x.ndim == 1:
        x = x.reshape(1, 2)
    diff = x[:, None, :] - all_centers[None, :, :]
    r2 = jnp.sum(diff ** 2, axis=2)
    G = jnp.exp(-r2 / (2.0 * sigma ** 2)) * signs
    return jnp.matmul(G, weights, precision="highest") + w1


if __name__ == "__main__":
    key = jax.random.PRNGKey(0)
    k_w, k_x = jax.random.split(key)

    # small, deterministic configuration: num_centers=8 -> ncx=ncv=8, C = 64 centers
    p = build_params(num_centers=8, final_pos=1.0, sigma=1.0, key=k_w)
    params = pack_rbf_params(p["sigma"], p["w1"], p["centers_x"],
                             p["centers_x_dot"], p["signs"], p["weights"])

    # batch of 256 input points (pos in [-1, 0.5], vel in [-5, 5]) -> exercises 2 N tiles
    N = 256
    u = jax.random.uniform(k_x, (N, 2), dtype=jnp.float32)
    x = jnp.stack([u[:, 0] * 1.5 - 1.0, u[:, 1] * 10.0 - 5.0], axis=1)

    out = jax.block_until_ready(rbf_forward(x, params))
    ref = rbf_forward_ref(x, p["sigma"], p["w1"], p["all_centers"], p["signs"], p["weights"])
    assert out.shape == (N,)
    assert jnp.allclose(out, ref, atol=1e-5, rtol=1e-5), (out, ref)

    # single-point path (module accepts a bare [pos, vel] pair)
    out1 = jax.block_until_ready(rbf_forward(x[0], params))
    assert out1.shape == (1,)
    assert jnp.allclose(out1[0], ref[0], atol=1e-5, rtol=1e-5), (out1, ref[0])

    print("KERNEL_OK")
</pallas_src>

<mosaic_0001>
module attributes {stable_mosaic.version = 11 : i64} {
  func.func @_rbf_sep_kernel(%arg0: i32, %arg1: memref<1xf32, #tpu.memory_space<smem>>, %arg2: memref<1xf32, #tpu.memory_space<smem>>, %arg3: memref<2x128xf32, #tpu.memory_space<vmem>>, %arg4: memref<80x1xf32, #tpu.memory_space<vmem>>, %arg5: memref<1x128xf32, #tpu.memory_space<vmem>>) attributes {dimension_semantics = [#tpu.dimension_semantics<parallel>], iteration_bounds = array<i64: 2>, scalar_prefetch = 0 : i64, scratch_operands = 0 : i64, tpu.core_type = #tpu.core_type<tc>, window_params = [{transform_indices = @transform_0, window_bounds = array<i64: 1>}, {transform_indices = @transform_1, window_bounds = array<i64: 1>}, {transform_indices = @transform_2, window_bounds = array<i64: 2, 128>}, {pipeline_mode = #tpu.pipeline_mode<synchronous>, transform_indices = @transform_3, window_bounds = array<i64: 80, 1>}, {transform_indices = @transform_4, window_bounds = array<i64: 1, 128>}]} {
    %c0 = arith.constant 0 : index
    %0 = memref.load %arg1[%c0] : memref<1xf32, #tpu.memory_space<smem>>
    %c0_0 = arith.constant 0 : index
    %c0_1 = arith.constant 0 : index
    %1 = vector.load %arg3[%c0_0, %c0_1] : memref<2x128xf32, #tpu.memory_space<vmem>>, vector<1x128xf32>
    %c1 = arith.constant 1 : index
    %c0_2 = arith.constant 0 : index
    %2 = vector.load %arg3[%c1, %c0_2] : memref<2x128xf32, #tpu.memory_space<vmem>>, vector<1x128xf32>
    %c0_3 = arith.constant 0 : index
    %c0_4 = arith.constant 0 : index
    %3 = vector.load %arg4[%c0_3, %c0_4] : memref<80x1xf32, #tpu.memory_space<vmem>>, vector<8x1xf32>
    %c8 = arith.constant 8 : index
    %c0_5 = arith.constant 0 : index
    %4 = vector.load %arg4[%c8, %c0_5] : memref<80x1xf32, #tpu.memory_space<vmem>>, vector<8x1xf32>
    %5 = vector.broadcast %1 : vector<1x128xf32> to vector<8x128xf32>
    %6 = vector.broadcast %3 : vector<8x1xf32> to vector<8x128xf32>
    %7 = arith.subf %5, %6 : vector<8x128xf32>
    %8 = arith.mulf %7, %7 : vector<8x128xf32>
    %9 = vector.broadcast %0 : f32 to vector<8x128xf32>
    %10 = arith.mulf %8, %9 : vector<8x128xf32>
    %11 = math.exp %10 : vector<8x128xf32>
    %12 = vector.broadcast %2 : vector<1x128xf32> to vector<8x128xf32>
    %13 = vector.broadcast %4 : vector<8x1xf32> to vector<8x128xf32>
    %14 = arith.subf %12, %13 : vector<8x128xf32>
    %15 = arith.mulf %14, %14 : vector<8x128xf32>
    %16 = vector.broadcast %0 : f32 to vector<8x128xf32>
    %17 = arith.mulf %15, %16 : vector<8x128xf32>
    %18 = math.exp %17 : vector<8x128xf32>
    %cst = arith.constant 0.000000e+00 : f32
    %19 = vector.broadcast %cst : f32 to vector<8x128xf32>
    %c16 = arith.constant 16 : index
    %c0_6 = arith.constant 0 : index
    %20 = vector.load %arg4[%c16, %c0_6] : memref<80x1xf32, #tpu.memory_space<vmem>>, vector<8x1xf32>
    %21 = vector.extract_strided_slice %18 {offsets = [0, 0], sizes = [1, 128], strides = [1, 1]} : vector<8x128xf32> to vector<1x128xf32>
    %22 = vector.broadcast %20 : vector<8x1xf32> to vector<8x128xf32>
    %23 = vector.broadcast %21 : vector<1x128xf32> to vector<8x128xf32>
    %24 = arith.mulf %22, %23 : vector<8x128xf32>
    %25 = arith.addf %19, %24 : vector<8x128xf32>
    %c24 = arith.constant 24 : index
    %c0_7 = arith.constant 0 : index
    %26 = vector.load %arg4[%c24, %c0_7] : memref<80x1xf32, #tpu.memory_space<vmem>>, vector<8x1xf32>
    %27 = vector.extract_strided_slice %18 {offsets = [1, 0], sizes = [1, 128], strides = [1, 1]} : vector<8x128xf32> to vector<1x128xf32>
    %28 = vector.broadcast %26 : vector<8x1xf32> to vector<8x128xf32>
    %29 = vector.broadcast %27 : vector<1x128xf32> to vector<8x128xf32>
    %30 = arith.mulf %28, %29 : vector<8x128xf32>
    %31 = arith.addf %25, %30 : vector<8x128xf32>
    %c32 = arith.constant 32 : index
    %c0_8 = arith.constant 0 : index
    %32 = vector.load %arg4[%c32, %c0_8] : memref<80x1xf32, #tpu.memory_space<vmem>>, vector<8x1xf32>
    %33 = vector.extract_strided_slice %18 {offsets = [2, 0], sizes = [1, 128], strides = [1, 1]} : vector<8x128xf32> to vector<1x128xf32>
    %34 = vector.broadcast %32 : vector<8x1xf32> to vector<8x128xf32>
    %35 = vector.broadcast %33 : vector<1x128xf32> to vector<8x128xf32>
    %36 = arith.mulf %34, %35 : vector<8x128xf32>
    %37 = arith.addf %31, %36 : vector<8x128xf32>
    %c40 = arith.constant 40 : index
    %c0_9 = arith.constant 0 : index
    %38 = vector.load %arg4[%c40, %c0_9] : memref<80x1xf32, #tpu.memory_space<vmem>>, vector<8x1xf32>
    %39 = vector.extract_strided_slice %18 {offsets = [3, 0], sizes = [1, 128], strides = [1, 1]} : vector<8x128xf32> to vector<1x128xf32>
    %40 = vector.broadcast %38 : vector<8x1xf32> to vector<8x128xf32>
    %41 = vector.broadcast %39 : vector<1x128xf32> to vector<8x128xf32>
    %42 = arith.mulf %40, %41 : vector<8x128xf32>
    %43 = arith.addf %37, %42 : vector<8x128xf32>
    %c48 = arith.constant 48 : index
    %c0_10 = arith.constant 0 : index
    %44 = vector.load %arg4[%c48, %c0_10] : memref<80x1xf32, #tpu.memory_space<vmem>>, vector<8x1xf32>
    %45 = vector.extract_strided_slice %18 {offsets = [4, 0], sizes = [1, 128], strides = [1, 1]} : vector<8x128xf32> to vector<1x128xf32>
    %46 = vector.broadcast %44 : vector<8x1xf32> to vector<8x128xf32>
    %47 = vector.broadcast %45 : vector<1x128xf32> to vector<8x128xf32>
    %48 = arith.mulf %46, %47 : vector<8x128xf32>
    %49 = arith.addf %43, %48 : vector<8x128xf32>
    %c56 = arith.constant 56 : index
    %c0_11 = arith.constant 0 : index
    %50 = vector.load %arg4[%c56, %c0_11] : memref<80x1xf32, #tpu.memory_space<vmem>>, vector<8x1xf32>
    %51 = vector.extract_strided_slice %18 {offsets = [5, 0], sizes = [1, 128], strides = [1, 1]} : vector<8x128xf32> to vector<1x128xf32>
    %52 = vector.broadcast %50 : vector<8x1xf32> to vector<8x128xf32>
    %53 = vector.broadcast %51 : vector<1x128xf32> to vector<8x128xf32>
    %54 = arith.mulf %52, %53 : vector<8x128xf32>
    %55 = arith.addf %49, %54 : vector<8x128xf32>
    %c64 = arith.constant 64 : index
    %c0_12 = arith.constant 0 : index
    %56 = vector.load %arg4[%c64, %c0_12] : memref<80x1xf32, #tpu.memory_space<vmem>>, vector<8x1xf32>
    %57 = vector.extract_strided_slice %18 {offsets = [6, 0], sizes = [1, 128], strides = [1, 1]} : vector<8x128xf32> to vector<1x128xf32>
    %58 = vector.broadcast %56 : vector<8x1xf32> to vector<8x128xf32>
    %59 = vector.broadcast %57 : vector<1x128xf32> to vector<8x128xf32>
    %60 = arith.mulf %58, %59 : vector<8x128xf32>
    %61 = arith.addf %55, %60 : vector<8x128xf32>
    %c72 = arith.constant 72 : index
    %c0_13 = arith.constant 0 : index
    %62 = vector.load %arg4[%c72, %c0_13] : memref<80x1xf32, #tpu.memory_space<vmem>>, vector<8x1xf32>
    %63 = vector.extract_strided_slice %18 {offsets = [7, 0], sizes = [1, 128], strides = [1, 1]} : vector<8x128xf32> to vector<1x128xf32>
    %64 = vector.broadcast %62 : vector<8x1xf32> to vector<8x128xf32>
    %65 = vector.broadcast %63 : vector<1x128xf32> to vector<8x128xf32>
    %66 = arith.mulf %64, %65 : vector<8x128xf32>
    %67 = arith.addf %61, %66 : vector<8x128xf32>
    %68 = arith.mulf %11, %67 : vector<8x128xf32>
    %cst_14 = arith.constant dense<0.000000e+00> : vector<128xf32>
    %69 = vector.multi_reduction <add>, %68, %cst_14 [0] : vector<8x128xf32> to vector<128xf32>
    %70 = vector.shape_cast %69 : vector<128xf32> to vector<1x128xf32>
    %c0_15 = arith.constant 0 : index
    %71 = memref.load %arg2[%c0_15] : memref<1xf32, #tpu.memory_space<smem>>
    %72 = vector.broadcast %71 : f32 to vector<1x128xf32>
    %73 = arith.addf %70, %72 : vector<1x128xf32>
    %c0_16 = arith.constant 0 : index
    %c0_17 = arith.constant 0 : index
    %74 = vector.load %arg5[%c0_16, %c0_17] : memref<1x128xf32, #tpu.memory_space<vmem>>, vector<1x128xf32>
    tpu.vector_store %arg5[%c0_16, %c0_17], %73 {strides = array<i32>} : memref<1x128xf32, #tpu.memory_space<vmem>>, vector<1x128xf32>,
    return
  }
  func.func @transform_0(%arg0: i32) -> i32 {
    %c0_i32 = arith.constant 0 : i32
    %c0_i32_0 = arith.constant 0 : i32
    return %c0_i32 : i32
  }
  func.func @transform_1(%arg0: i32) -> i32 {
    %c0_i32 = arith.constant 0 : i32
    %c0_i32_0 = arith.constant 0 : i32
    return %c0_i32 : i32
  }
  func.func @transform_2(%arg0: i32) -> (i32, i32) {
    %c0_i32 = arith.constant 0 : i32
    %c0_i32_0 = arith.constant 0 : i32
    return %c0_i32, %arg0 : i32, i32
  }
  func.func @transform_3(%arg0: i32) -> (i32, i32) {
    %c0_i32 = arith.constant 0 : i32
    %c0_i32_0 = arith.constant 0 : i32
    %c0_i32_1 = arith.constant 0 : i32
    return %c0_i32, %c0_i32_0 : i32, i32
  }
  func.func @transform_4(%arg0: i32) -> (i32, i32) {
    %c0_i32 = arith.constant 0 : i32
    %c0_i32_0 = arith.constant 0 : i32
    return %c0_i32, %arg0 : i32, i32
  }
}

</mosaic_0001>

<bundles_post_ra>
// kernel: tpu_custom_call.1
= control target key start
LH: loop header
LB: loop body
LE: loop exit
PB: predicated region body
PF: predicated region fallthrough
CT: control target
= control target key end

     0   :  { %s671_s0 = inlined_call_operand.<no memory space> [shape: f32[1], index: 0, kind: input, shape index: {}]   ;;  %s672_s1 = inlined_call_operand.<no memory space> [shape: f32[1], index: 1, kind: input, shape index: {}]   ;;  %s673_s2 = inlined_call_operand.vmem [shape: f32[2,256], index: 2, kind: input, shape index: {}]   ;;  %s674_s3 = inlined_call_operand.vmem [shape: f32[80,1], index: 3, kind: input, shape index: {}]   ;;  %s675_s4 = inlined_call_operand.hbm [shape: f32[1,256], index: 4, kind: output, shape index: {}]  }
   0x1   :  { %9 = sst [smem:[#allocation2]] %s671_s0 }
   0x2   :  { %10 = sst [smem:[#allocation3]] %s672_s1 }
   0x3   :  { %11 = vsyncpa [#allocation5], 0 }
   0x4   :  { %13 = vsyncpa [#allocation5 + $0x1], 0  ;;  %s554_s19 = smov 0   ;;  %s556_s20 = smov 0  }
   0x5   :  { %s558_s21 = smov 0   ;;  %s560_s22 = smov 0  }
   0x6 LB: > { %s575_s0 = sadd.s32 4294967295, %s519_s22   ;;  %s403_s1 = sadd.s32 4294967294, %s519_s22   ;;  %s519_s22 = sphi %s560_s22, %s681_s22   ;;  %s515_s21 = sphi %s558_s21, %s680_s21   ;;  %s511_s20 = sphi %s556_s20, %s679_s20   ;;  %s507_s19 = sphi %s554_s19, %s678_s19  }
   0x7   : > { %s579_s23 = sadd.s32 1, %s519_s22   ;;  %s115_s24 = sadd.s32 1, %s515_s21 }
   0x8   : > { %s112_s25 = ssub.s32 %s519_s22, %s579_s23  ;;  %p125_p0 = scmp.ne.s32.totalorder %s515_s21, %s511_s20 }
   0x9   : > { %p113_p1 = scmp.eq.s32.totalorder %s112_s25, 0  ;;  %p126_p2 = scmp.eq.s32.totalorder %s575_s0, 1 }
   0xa   : > { %p131_p3 = scmp.ne.s32.totalorder %s511_s20, %s507_s19  ;;  %p132_p4 = scmp.eq.s32.totalorder %s403_s1, 1 }
   0xb   : > { %s590_s26 = scalar_select %p113_p1, %s515_s21, %s115_s24  }
   0xc   : > { %p592_p5 = por %p126_p2, %p125_p0  ;;  %p596_p6 = por %p132_p4, %p131_p3 }
   0xd   : > { %p406_p7 = scmp.ge.s32.totalorder %s519_s22, 1  ;;  %p166_p8 = scmp.lt.s32.totalorder %s519_s22, 3 }
   0xf   : > { %p167_p9 = pnand %p406_p7, %p166_p8 }
  0x10   : > { %p190_p10 = scmp.lt.s32.totalorder (!%p167_p9), %s575_s0, 1  ;;  %s194_s6 = sld [smem:[#allocation2]] (!%p167_p9) }
  0x11   : > { %170 = sbr.rel (%p167_p9) target bundleno = 217 (0xd9), region = 36  ;;  %s331_s10 = sld [smem:[#allocation3]] (!%p167_p9) }
  0x12   : > { %s188_s11 = sand.u32 (!%p167_p9), 1, %s511_s20   ;;  %s410_s12 = sshll.u32 (!%p167_p9), %s575_s0, 4 }
  0x13   : > { %s189_s13 = scalar_lea.vmem (!%p167_p9), [#allocation4], %s188_s11  ;;  %s346_s17 = scalar_lea.hbm (!%p167_p9), %s675_s4, %s410_s12 }
  0x14   : > { %s348_s14 = sshll.u32 (!%p167_p9), %s189_s13, 4  ;;  %s336_s18 = scalar_lea.sflag (!%p167_p9), [#allocation5], %s188_s11  ;;  %s349_s14 = int_to_ptr.vmem [resolvable:$true] %s348_s14 }
  0x15   : > { %s459_s1 = scalar_lea.vmem (!%p167_p9), %s349_s14, 16  ;;  %s522_s24 = smov (!%p167_p9), [#allocation4]  }
  0x16   : > { %v198_v0 = vld [vmem:[%s674_s3 + $0x8] sm:$0xff]  ;;  %v228_v1 = vld [vmem:[%s674_s3 + $0x10] sm:$0xff]  ;;  %v521_v2 = vmov 0   ;;  %v197_v3 = vld [vmem:[%s674_s3] sm:$0xff]  ;;  %s191_s30 = scalar_select %p190_p10, %s575_s0, 1  ;;  %v210_v14 = vstv %s194_s6  ;;  %v234_v20 = vlaneseq }
  0x17   : > { %453 = vset.pattern.permute.xlu0 %v521_v2  ;;  %454 = vset.pattern.permute.xlu1 %v521_v2  ;;  %v240_v4 = vld [vmem:[%s674_s3 + $0x18] sm:$0xff]  ;;  %v252_v5 = vld [vmem:[%s674_s3 + $0x20] sm:$0xff]  ;;  %v264_v6 = vld [vmem:[%s674_s3 + $0x28] sm:$0xff]  ;;  %p460_p11 = scmp.ne.s32.totalorder %s349_s14, %s459_s1  ;;  %s463_s25 = sshll.u32 %s522_s24, 4  ;;  %s464_s25 = int_to_ptr.vmem [resolvable:$false] %s463_s25 }
  0x18   : > { %220 = vperm.xlu0 %453, %v198_v0   ;;  %231 = vperm.xlu1 %454, %v228_v1   ;;  %v276_v7 = vld [vmem:[%s674_s3 + $0x30] sm:$0xff]  ;;  %v288_v8 = vld [vmem:[%s674_s3 + $0x38] sm:$0xff]  ;;  %v300_v9 = vld [vmem:[%s674_s3 + $0x40] sm:$0xff]  ;;  %s407_s5 = sshll.u32 %s191_s30, 1  ;;  %v235_v23 = vshrl.u32 %v234_v20, 7  ;;  %s465_s0 = scalar_lea.vmem %s464_s25, 32 }
  0x19   : > { %v312_v10 = vld [vmem:[%s674_s3 + $0x48] sm:$0xff]  ;;  %s193_s9 = scalar_lea.vmem %s673_s2, %s407_s5  ;;  %p461_p12 = pnand %p460_p11, %p592_p5 }
  0x1a   : > { %v409_v11 = vld [vmem:[%s193_s9 + $0x1] ss:$0 sm:$0xff]  ;;  %v408_v19 = vld [vmem:[%s193_s9] ss:$0 sm:$0xff]  ;;  %v236_v26 = vsub.s32 0, %v235_v23  ;;  %v248_v28 = vsub.s32 1, %v235_v23  ;;  %p466_p0 = scmp.lt.s32.totalorder %s349_s14, %s464_s25  ;;  %p467_p1 = scmp.lt.s32.totalorder %s465_s0, %s459_s1 }
  0x1b   : > { %v260_v29 = vsub.s32 2, %v235_v23  ;;  %v272_v30 = vsub.s32 3, %v235_v23  ;;  %v284_v33 = vsub.s32 4, %v235_v23  ;;  %v296_v42 = vsub.s32 5, %v235_v23  ;;  %p462_p13 = pneg %p461_p12 }
  0x1c   : > { %205 = vperm.xlu0 %453, %v197_v3   ;;  %243 = vperm.xlu1 %454, %v240_v4   ;;  %v308_v43 = vsub.s32 6, %v235_v23  ;;  %v320_v51 = vsub.s32 7, %v235_v23  ;;  %p468_p2 = por %p467_p1, %p466_p0 }
  0x1e   : > { %p469_p3 = pnand %p468_p2, %p462_p13 }
  0x20   : > { %255 = vperm.xlu0 %453, %v252_v5   ;;  %267 = vperm.xlu1 %454, %v264_v6  }
  0x24   : > { %279 = vperm.xlu0 %453, %v276_v7   ;;  %291 = vperm.xlu1 %454, %v288_v8  }
  0x28   : > { %303 = vperm.xlu0 %453, %v300_v9   ;;  %315 = vperm.xlu1 %454, %v312_v10   ;;  %v332_v9 = vstv %s331_s10 }
  0x93   : > { %v221_v12 = vpop.permute.xlu0 %220  ;;  %v232_v22 = vpop.permute.xlu1 %231 }
  0x94   : > { %v223_v13 = vsub.f32 %v409_v11, %v221_v12 }
  0x96   : > { %v224_v15 = vmul.f32 %v223_v13, %v223_v13 }
  0x97   : > { %v206_v18 = vpop.permute.xlu0 %205  ;;  %v244_v25 = vpop.permute.xlu1 %243 }
  0x98   : > { %v225_v16 = vmul.f32 %v224_v15, %v210_v14  ;;  %v208_v21 = vsub.f32 %v408_v19, %v206_v18 }
  0x9a   : > { %v226_v17 = vmul.f32 1.442695, %v225_v16  ;;  %v209_v24 = vmul.f32 %v208_v21, %v208_v21 }
  0x9b   : > { %v256_v32 = vpop.permute.xlu0 %255  ;;  %v268_v38 = vpop.permute.xlu1 %267 }
  0x9c   : > { %455 = vpow2.f32 %v226_v17  ;;  %v211_v27 = vmul.f32 %v210_v14, %v209_v24 }
  0x9e   : > { %v212_v35 = vmul.f32 1.442695, %v211_v27 }
  0x9f   : > { %v280_v47 = vpop.permute.xlu0 %279  ;;  %v292_v52 = vpop.permute.xlu1 %291 }
  0xa0   : > { %457 = vpow2.f32 %v212_v35 }
  0xa3   : > { %v304_v59 = vpop.permute.xlu0 %303  ;;  %v316_v62 = vpop.permute.xlu1 %315 }
  0xa9   : > { %v456_v31 = vpop.eup %455 }
  0xaa   : > { %v237_v34 = vrot.slane %v456_v31, %v236_v26  ;;  %v249_v36 = vrot.slane %v456_v31, %v248_v28  ;;  %v261_v37 = vrot.slane %v456_v31, %v260_v29  ;;  %v273_v41 = vrot.slane %v456_v31, %v272_v30 }
  0xab   : > { %v285_v46 = vrot.slane %v456_v31, %v284_v33  ;;  %v297_v50 = vrot.slane %v456_v31, %v296_v42  ;;  %v309_v55 = vrot.slane %v456_v31, %v308_v43  ;;  %v321_v58 = vrot.slane %v456_v31, %v320_v51 }
  0xac   : > { %v238_v39 = vmul.f32 %v237_v34, %v232_v22  ;;  %v250_v40 = vmul.f32 %v249_v36, %v244_v25  ;;  %v262_v45 = vmul.f32 %v261_v37, %v256_v32  ;;  %v274_v49 = vmul.f32 %v273_v41, %v268_v38 }
  0xad   : > { %v286_v54 = vmul.f32 %v285_v46, %v280_v47  ;;  %v298_v57 = vmul.f32 %v297_v50, %v292_v52  ;;  %v310_v61 = vmul.f32 %v309_v55, %v304_v59  ;;  %v322_v0 = vmul.f32 %v321_v58, %v316_v62  ;;  %v458_v2 = vpop.eup %457 }
  0xae   : > { %v251_v44 = vadd.f32 %v250_v40, %v238_v39 }
  0xb0   : > { %v263_v48 = vadd.f32 %v262_v45, %v251_v44 }
  0xb2   : > { %v275_v53 = vadd.f32 %v274_v49, %v263_v48 }
  0xb4   : > { %v287_v56 = vadd.f32 %v286_v54, %v275_v53 }
  0xb6   : > { %v299_v60 = vadd.f32 %v298_v57, %v287_v56 }
  0xb8   : > { %v311_v63 = vadd.f32 %v310_v61, %v299_v60 }
  0xba   : > { %v323_v1 = vadd.f32 %v322_v0, %v311_v63 }
  0xbc   : > { %v324_v3 = vmul.f32 %v458_v2, %v323_v1 }
  0xbe   : > { %v325_v4 = vrot.slane %v324_v3, 4 }
  0xc0   : > { %v326_v5 = vadd.f32 %v325_v4, %v324_v3 }
  0xc2   : > { %v327_v6 = vrot.slane %v326_v5, 2 }
  0xc4   : > { %v328_v7 = vadd.f32 %v327_v6, %v326_v5 }
  0xc6   : > { %v329_v8 = vrot.slane %v328_v7, 1 }
  0xc8   : > { %v330_v10 = vadd.f32 %v329_v8, %v328_v7 }
  0xca   : > { %v333_v11 = vadd.f32 %v332_v9, %v330_v10 }
  0xcc   : > { %334 = vst [vmem:[%s189_s13] sm:$0x1] %v333_v11 }
  0xcd   : > { %472 = shalt.err (!%p469_p3)
}
  0xce   : > { %s473_s29 = scalar_lea.hbm %s346_s17, 16  ;;  %s477_s6 = scalar_lea.hbm %s675_s4, 32 }
  0xcf   : > { %p474_p4 = scmp.ne.s32.totalorder %s346_s17, %s473_s29  ;;  %p478_p9 = scmp.lt.s32.totalorder %s346_s17, %s675_s4 }
  0xd0   : > { %p479_p10 = scmp.lt.s32.totalorder %s477_s6, %s473_s29 }
  0xd1   : > { %p475_p7 = pnand %p474_p4, %p592_p5 }
  0xd2   : > { %p480_p11 = por %p479_p10, %p478_p9 }
  0xd3   : > { %p476_p8 = pneg %p475_p7 }
  0xd5   : > { %p481_p12 = pnand %p480_p11, %p476_p8 }
  0xd7   : > { %484 = shalt.err (!%p481_p12)
}
  0xd8   : > { %413 = dma.vmem_to_hbm [thread:$0]  (%p592_p5), %s349_s14, 16, %s346_s17, %s336_s18  }
  0xd9 PF: > { %p419_p13 = scmp.ge.s32.totalorder %s519_s22, 2  ;;  %s360_s9 = sand.u32 1, %s507_s19  }
  0xda   : > { %s361_s10 = scalar_lea.sflag [#allocation5], %s360_s9 }
  0xdb   : > { %p416_p0 = pnand %p419_p13, %p596_p6 }
  0xdd   : > { %p417_p1 = pneg %p416_p0 }
  0xdf   : > { %502 = dma.done.wait (%p417_p1), %s361_s10, 16  }
  0xe0   : > { %504 = vsyncadd (%p417_p1), %s361_s10, 4294967280  ;;  %p16_p2 = scmp.ge.s32.totalorder %s579_s23, 4   ;;  %s678_s19 = smov %s511_s20 }
  0xe1   : > { %s679_s20 = smov %s515_s21  ;;  %s680_s21 = smov %s590_s26 }
  0xe2   : > { %s681_s22 = smov %s579_s23  ;;  %18 = sbr.rel (!%p16_p2) target bundleno = 6 (0x6), region = 71 }
  0xe7   :  { %365 = vsyncpa [#allocation5], 1 }
  0xe8   :  { %367 = vsyncpa [#allocation5 + $0x1], 1 }

</bundles_post_ra>
